<compile_context>
chip_gen: v7x
topology: tpu7x:2x2x1
jax: 0.10.0
libtpu: 0.0.40
codegen_flags: <defaults>
</compile_context>

<pallas_src>
import functools

import jax
import jax.numpy as jnp
from jax import lax
from jax.experimental import pallas as pl
from jax.experimental.pallas import tpu as pltpu


def _round_up(x, m):
    return ((x + m - 1) // m) * m


def _l_std_kernel(org_ref, enh_ref, o_ref,
                  osum_ref, osq_ref, esum_ref, esq_ref,
                  *, n_pixels, n_channels, rows_total, chunk_rows, acc_rows,
                  mask_tail):
    # org_ref / enh_ref : (bb, C, S, L) VMEM tiles (L lane-dense)
    # o_ref             : (bb, 1, 1) output block (written only at finalize)
    # *_ref scratch     : (bb, acc_rows, L) f32 accumulators, persistent over j
    j = pl.program_id(1)

    @pl.when(j == 0)
    def _init():
        osum_ref[...] = jnp.zeros_like(osum_ref)
        osq_ref[...] = jnp.zeros_like(osq_ref)
        esum_ref[...] = jnp.zeros_like(esum_ref)
        esq_ref[...] = jnp.zeros_like(esq_ref)

    inv_c = jnp.float32(1.0 / n_channels)
    # Channel mean: reduce over a non-minor axis -> plain VPU adds of full
    # vregs, accumulated in f32 (bf16 inputs stay bf16 through the DMA).
    org_m = jnp.sum(org_ref[...], axis=1, dtype=jnp.float32) * inv_c  # (bb,S,L)
    enh_m = jnp.sum(enh_ref[...], axis=1, dtype=jnp.float32) * inv_c  # (bb,S,L)

    if mask_tail:
        # Last row-chunk may extend past the real rows; zero out OOB rows so
        # unspecified block contents never reach the accumulators.
        valid = rows_total - j * chunk_rows
        row_ids = lax.broadcasted_iota(jnp.int32, org_m.shape[1:], 0)  # (S, L)
        keep = row_ids < valid
        org_m = jnp.where(keep, org_m, 0.0)
        enh_m = jnp.where(keep, enh_m, 0.0)

    bb, s_rows, lanes = org_m.shape
    if acc_rows == s_rows:
        # Single chunk / tiny-row case: accumulate the chunk directly.
        osum_ref[...] += org_m
        osq_ref[...] += org_m * org_m
        esum_ref[...] += enh_m
        esq_ref[...] += enh_m * enh_m
    else:
        # Regroup the sublane axis into (groups, acc_rows) — a tile-aligned
        # view for f32 — and reduce the group axis: VPU adds only, no XLU in
        # the steady-state loop.
        g = s_rows // acc_rows
        om = org_m.reshape(bb, g, acc_rows, lanes)
        em = enh_m.reshape(bb, g, acc_rows, lanes)
        osum_ref[...] += jnp.sum(om, axis=1)
        osq_ref[...] += jnp.sum(om * om, axis=1)
        esum_ref[...] += jnp.sum(em, axis=1)
        esq_ref[...] += jnp.sum(em * em, axis=1)

    @pl.when(j == pl.num_programs(1) - 1)
    def _finalize():
        n = jnp.float32(n_pixels)
        denom = jnp.float32(max(n_pixels - 1, 1))  # Bessel (unbiased) divisor
        o_s = jnp.sum(osum_ref[...], axis=(1, 2), keepdims=True)   # (bb,1,1)
        o_ss = jnp.sum(osq_ref[...], axis=(1, 2), keepdims=True)
        e_s = jnp.sum(esum_ref[...], axis=(1, 2), keepdims=True)
        e_ss = jnp.sum(esq_ref[...], axis=(1, 2), keepdims=True)
        org_var = jnp.maximum(o_ss - o_s * o_s / n, 0.0) / denom
        enh_var = jnp.maximum(e_ss - e_s * e_s / n, 0.0) / denom
        org_std = jnp.sqrt(org_var)
        enh_std = jnp.sqrt(enh_var)
        s = (enh_std - jnp.maximum(org_std / 5.0, 0.005)) ** 2
        o_ref[...] = s.astype(o_ref.dtype)


def l_std(org, enhance, *, target_tile_bytes=3 << 20):
    """org, enhance: (B, C, H, W). Returns (B, 1) float32, matching torch L_std."""
    assert org.shape == enhance.shape and org.ndim == 4
    b, c, h, w = org.shape
    hw = h * w
    itemsize = jnp.dtype(org.dtype).itemsize
    sub = {4: 8, 2: 16, 1: 32}.get(itemsize, 8)   # sublane packing per dtype

    org_f = org.reshape(b, c, hw)
    enh_f = enhance.reshape(b, c, hw)

    # Lane-dense spatial layout (B, C, rows, lanes), lanes on the 128-lane axis.
    if hw % 128 == 0:
        lanes, rows = 128, hw // 128              # common case: no copy, no pad
    elif hw <= 32768:
        lanes, rows = hw, 1                       # small ragged image: one full-width row
    else:
        pad = (-hw) % 128                         # rare fallback: zero pixels add 0 to sums
        org_f = jnp.pad(org_f, ((0, 0), (0, 0), (0, pad)))
        enh_f = jnp.pad(enh_f, ((0, 0), (0, 0), (0, pad)))
        lanes, rows = 128, (hw + pad) // 128
    org_f = org_f.reshape(b, c, rows, lanes)
    enh_f = enh_f.reshape(b, c, rows, lanes)

    # Spatial chunking along rows: ~3 MiB per input tile keeps
    # 2 inputs x 2 pipeline buffers under the 16 MiB v5e scoped-VMEM default
    # (v6e/v7x: 32 MiB) while still streaming several MB of HBM per step.
    bytes_per_row = c * _round_up(lanes, 128) * itemsize
    max_rows = max(sub, (target_tile_bytes // bytes_per_row) // sub * sub)
    if rows <= max_rows:
        chunk_rows, n_chunks = rows, 1
    else:
        chunk_rows, n_chunks = max_rows, pl.cdiv(rows, max_rows)
    mask_tail = (n_chunks > 1) and (rows % chunk_rows != 0)

    # Vreg-shaped accumulator height (tree accumulation, VPU-only steady state).
    acc_rows = 8 if chunk_rows % 8 == 0 else chunk_rows

    # Batch packing for tiny single-chunk images: account for the real
    # (sublane/lane padded) VMEM tile and keep >= 2 programs on the parallel
    # axis so both v7x TensorCores get work when B >= 2.
    padded_tile = c * _round_up(chunk_rows, sub) * _round_up(lanes, 128) * itemsize
    bb = 1
    if n_chunks == 1 and b > 1:
        bb_cap = max(1, b // 2)
        for cand in range(bb_cap, 0, -1):
            if b % cand == 0 and cand * padded_tile <= target_tile_bytes:
                bb = cand
                break
    # TODO(synk): for B == 1 with multi-chunk images, a second parallel axis
    # splitting the spatial reduction would keep both v7x TCs busy.

    grid = (b // bb, n_chunks)

    kernel = functools.partial(
        _l_std_kernel, n_pixels=hw, n_channels=c, rows_total=rows,
        chunk_rows=chunk_rows, acc_rows=acc_rows, mask_tail=mask_tail)

    # Advisory cost estimate: purely bandwidth-bound reduction.
    flops = 2 * b * hw * (c + 3)
    bytes_accessed = 2 * b * c * hw * itemsize + b * 4
    cost = pl.CostEstimate(flops=flops, transcendentals=2 * b,
                           bytes_accessed=bytes_accessed)

    out = pl.pallas_call(
        kernel,
        out_shape=jax.ShapeDtypeStruct((b, 1, 1), jnp.float32),
        grid_spec=pltpu.PrefetchScalarGridSpec(
            num_scalar_prefetch=0,
            grid=grid,
            in_specs=[
                pl.BlockSpec((bb, c, chunk_rows, lanes), lambda i, j: (i, 0, j, 0)),
                pl.BlockSpec((bb, c, chunk_rows, lanes), lambda i, j: (i, 0, j, 0)),
            ],
            out_specs=pl.BlockSpec((bb, 1, 1), lambda i, j: (i, 0, 0)),
            scratch_shapes=[pltpu.VMEM((bb, acc_rows, lanes), jnp.float32)] * 4,
        ),
        compiler_params=pltpu.CompilerParams(
            dimension_semantics=("parallel", "arbitrary"),
        ),
        cost_estimate=cost,
    )(org_f, enh_f)
    return out.reshape(b, 1)


def _l_std_ref(org, enhance):
    # Pure-JAX reference mirroring the PyTorch module (unbiased std).
    org_mean = jnp.mean(org, axis=1, keepdims=True)
    enh_mean = jnp.mean(enhance, axis=1, keepdims=True)
    org_std = jnp.std(org_mean, axis=(2, 3), ddof=1)        # (B, 1)
    enh_std = jnp.std(enh_mean, axis=(2, 3), ddof=1)        # (B, 1)
    return (enh_std - jnp.maximum(org_std / 5.0, 0.005)) ** 2


if __name__ == "__main__":
    key = jax.random.PRNGKey(0)
    k1, k2 = jax.random.split(key)
    # Small shapes consistent with the module: batch=2, RGB channels, 16x16.
    org = jax.random.uniform(k1, (2, 3, 16, 16), dtype=jnp.float32)
    enhance = jax.random.uniform(k2, (2, 3, 16, 16), dtype=jnp.float32)

    out = l_std(org, enhance)
    out = jax.block_until_ready(out)

    ref = _l_std_ref(org, enhance)
    assert out.shape == (2, 1), out.shape
    assert jnp.allclose(out, ref, atol=1e-5, rtol=1e-4), (out, ref)

    print("KERNEL_OK")
</pallas_src>

<mosaic_0001>
module attributes {stable_mosaic.version = 11 : i64} {
  func.func @_l_std_kernel(%arg0: i32, %arg1: i32, %arg2: memref<1x3x2x128xf32, #tpu.memory_space<vmem>>, %arg3: memref<1x3x2x128xf32, #tpu.memory_space<vmem>>, %arg4: memref<1x1x1xf32, #tpu.memory_space<vmem>>, %arg5: memref<1x2x128xf32, #tpu.memory_space<vmem>>, %arg6: memref<1x2x128xf32, #tpu.memory_space<vmem>>, %arg7: memref<1x2x128xf32, #tpu.memory_space<vmem>>, %arg8: memref<1x2x128xf32, #tpu.memory_space<vmem>>) attributes {dimension_semantics = [#tpu.dimension_semantics<parallel>, #tpu.dimension_semantics<arbitrary>], iteration_bounds = array<i64: 2, 1>, scalar_prefetch = 0 : i64, scratch_operands = 4 : i64, tpu.core_type = #tpu.core_type<tc>, window_params = [{transform_indices = @transform_0, window_bounds = array<i64: 1, 3, 2, 128>}, {transform_indices = @transform_1, window_bounds = array<i64: 1, 3, 2, 128>}, {transform_indices = @transform_2, window_bounds = array<i64: 1, 1, 1>}]} {
    %c0_i32 = arith.constant 0 : i32
    %0 = arith.cmpi eq, %arg1, %c0_i32 : i32
    %1 = arith.extui %0 : i1 to i32
    %c0_i32_0 = arith.constant 0 : i32
    %2 = arith.cmpi ne, %1, %c0_i32_0 : i32
    scf.if %2 {
      %cst_37 = arith.constant 0.000000e+00 : f32
      %28 = vector.broadcast %cst_37 : f32 to vector<1x2x128xf32>
      %c0_38 = arith.constant 0 : index
      %c0_39 = arith.constant 0 : index
      %c0_40 = arith.constant 0 : index
      %29 = vector.load %arg5[%c0_38, %c0_39, %c0_40] : memref<1x2x128xf32, #tpu.memory_space<vmem>>, vector<1x2x128xf32>
      tpu.vector_store %arg5[%c0_38, %c0_39, %c0_40], %28 {strides = array<i32>} : memref<1x2x128xf32, #tpu.memory_space<vmem>>, vector<1x2x128xf32>,
      %cst_41 = arith.constant 0.000000e+00 : f32
      %30 = vector.broadcast %cst_41 : f32 to vector<1x2x128xf32>
      %c0_42 = arith.constant 0 : index
      %c0_43 = arith.constant 0 : index
      %c0_44 = arith.constant 0 : index
      %31 = vector.load %arg6[%c0_42, %c0_43, %c0_44] : memref<1x2x128xf32, #tpu.memory_space<vmem>>, vector<1x2x128xf32>
      tpu.vector_store %arg6[%c0_42, %c0_43, %c0_44], %30 {strides = array<i32>} : memref<1x2x128xf32, #tpu.memory_space<vmem>>, vector<1x2x128xf32>,
      %cst_45 = arith.constant 0.000000e+00 : f32
      %32 = vector.broadcast %cst_45 : f32 to vector<1x2x128xf32>
      %c0_46 = arith.constant 0 : index
      %c0_47 = arith.constant 0 : index
      %c0_48 = arith.constant 0 : index
      %33 = vector.load %arg7[%c0_46, %c0_47, %c0_48] : memref<1x2x128xf32, #tpu.memory_space<vmem>>, vector<1x2x128xf32>
      tpu.vector_store %arg7[%c0_46, %c0_47, %c0_48], %32 {strides = array<i32>} : memref<1x2x128xf32, #tpu.memory_space<vmem>>, vector<1x2x128xf32>,
      %cst_49 = arith.constant 0.000000e+00 : f32
      %34 = vector.broadcast %cst_49 : f32 to vector<1x2x128xf32>
      %c0_50 = arith.constant 0 : index
      %c0_51 = arith.constant 0 : index
      %c0_52 = arith.constant 0 : index
      %35 = vector.load %arg8[%c0_50, %c0_51, %c0_52] : memref<1x2x128xf32, #tpu.memory_space<vmem>>, vector<1x2x128xf32>
      tpu.vector_store %arg8[%c0_50, %c0_51, %c0_52], %34 {strides = array<i32>} : memref<1x2x128xf32, #tpu.memory_space<vmem>>, vector<1x2x128xf32>,
    } else {
    }
    %c0 = arith.constant 0 : index
    %c0_1 = arith.constant 0 : index
    %c0_2 = arith.constant 0 : index
    %c0_3 = arith.constant 0 : index
    %3 = vector.load %arg2[%c0, %c0_1, %c0_2, %c0_3] : memref<1x3x2x128xf32, #tpu.memory_space<vmem>>, vector<1x3x2x128xf32>
    %cst = arith.constant dense<0.000000e+00> : vector<1x2x128xf32>
    %4 = vector.multi_reduction <add>, %3, %cst [1] : vector<1x3x2x128xf32> to vector<1x2x128xf32>
    %cst_4 = arith.constant 0.333333343 : f32
    %5 = vector.broadcast %cst_4 : f32 to vector<1x2x128xf32>
    %6 = arith.mulf %4, %5 : vector<1x2x128xf32>
    %c0_5 = arith.constant 0 : index
    %c0_6 = arith.constant 0 : index
    %c0_7 = arith.constant 0 : index
    %c0_8 = arith.constant 0 : index
    %7 = vector.load %arg3[%c0_5, %c0_6, %c0_7, %c0_8] : memref<1x3x2x128xf32, #tpu.memory_space<vmem>>, vector<1x3x2x128xf32>
    %cst_9 = arith.constant dense<0.000000e+00> : vector<1x2x128xf32>
    %8 = vector.multi_reduction <add>, %7, %cst_9 [1] : vector<1x3x2x128xf32> to vector<1x2x128xf32>
    %cst_10 = arith.constant 0.333333343 : f32
    %9 = vector.broadcast %cst_10 : f32 to vector<1x2x128xf32>
    %10 = arith.mulf %8, %9 : vector<1x2x128xf32>
    %c0_11 = arith.constant 0 : index
    %c0_12 = arith.constant 0 : index
    %c0_13 = arith.constant 0 : index
    %11 = vector.load %arg5[%c0_11, %c0_12, %c0_13] : memref<1x2x128xf32, #tpu.memory_space<vmem>>, vector<1x2x128xf32>
    %12 = arith.addf %11, %6 : vector<1x2x128xf32>
    %c0_14 = arith.constant 0 : index
    %c0_15 = arith.constant 0 : index
    %c0_16 = arith.constant 0 : index
    %13 = vector.load %arg5[%c0_14, %c0_15, %c0_16] : memref<1x2x128xf32, #tpu.memory_space<vmem>>, vector<1x2x128xf32>
    tpu.vector_store %arg5[%c0_14, %c0_15, %c0_16], %12 {strides = array<i32>} : memref<1x2x128xf32, #tpu.memory_space<vmem>>, vector<1x2x128xf32>,
    %c0_17 = arith.constant 0 : index
    %c0_18 = arith.constant 0 : index
    %c0_19 = arith.constant 0 : index
    %14 = vector.load %arg6[%c0_17, %c0_18, %c0_19] : memref<1x2x128xf32, #tpu.memory_space<vmem>>, vector<1x2x128xf32>
    %15 = arith.mulf %6, %6 : vector<1x2x128xf32>
    %16 = arith.addf %14, %15 : vector<1x2x128xf32>
    %c0_20 = arith.constant 0 : index
    %c0_21 = arith.constant 0 : index
    %c0_22 = arith.constant 0 : index
    %17 = vector.load %arg6[%c0_20, %c0_21, %c0_22] : memref<1x2x128xf32, #tpu.memory_space<vmem>>, vector<1x2x128xf32>
    tpu.vector_store %arg6[%c0_20, %c0_21, %c0_22], %16 {strides = array<i32>} : memref<1x2x128xf32, #tpu.memory_space<vmem>>, vector<1x2x128xf32>,
    %c0_23 = arith.constant 0 : index
    %c0_24 = arith.constant 0 : index
    %c0_25 = arith.constant 0 : index
    %18 = vector.load %arg7[%c0_23, %c0_24, %c0_25] : memref<1x2x128xf32, #tpu.memory_space<vmem>>, vector<1x2x128xf32>
    %19 = arith.addf %18, %10 : vector<1x2x128xf32>
    %c0_26 = arith.constant 0 : index
    %c0_27 = arith.constant 0 : index
    %c0_28 = arith.constant 0 : index
    %20 = vector.load %arg7[%c0_26, %c0_27, %c0_28] : memref<1x2x128xf32, #tpu.memory_space<vmem>>, vector<1x2x128xf32>
    tpu.vector_store %arg7[%c0_26, %c0_27, %c0_28], %19 {strides = array<i32>} : memref<1x2x128xf32, #tpu.memory_space<vmem>>, vector<1x2x128xf32>,
    %c0_29 = arith.constant 0 : index
    %c0_30 = arith.constant 0 : index
    %c0_31 = arith.constant 0 : index
    %21 = vector.load %arg8[%c0_29, %c0_30, %c0_31] : memref<1x2x128xf32, #tpu.memory_space<vmem>>, vector<1x2x128xf32>
    %22 = arith.mulf %10, %10 : vector<1x2x128xf32>
    %23 = arith.addf %21, %22 : vector<1x2x128xf32>
    %c0_32 = arith.constant 0 : index
    %c0_33 = arith.constant 0 : index
    %c0_34 = arith.constant 0 : index
    %24 = vector.load %arg8[%c0_32, %c0_33, %c0_34] : memref<1x2x128xf32, #tpu.memory_space<vmem>>, vector<1x2x128xf32>
    tpu.vector_store %arg8[%c0_32, %c0_33, %c0_34], %23 {strides = array<i32>} : memref<1x2x128xf32, #tpu.memory_space<vmem>>, vector<1x2x128xf32>,
    %c0_i32_35 = arith.constant 0 : i32
    %25 = arith.cmpi eq, %arg1, %c0_i32_35 : i32
    %26 = arith.extui %25 : i1 to i32
    %c0_i32_36 = arith.constant 0 : i32
    %27 = arith.cmpi ne, %26, %c0_i32_36 : i32
    scf.if %27 {
      %c0_37 = arith.constant 0 : index
      %c0_38 = arith.constant 0 : index
      %c0_39 = arith.constant 0 : index
      %28 = vector.load %arg5[%c0_37, %c0_38, %c0_39] : memref<1x2x128xf32, #tpu.memory_space<vmem>>, vector<1x2x128xf32>
      %cst_40 = arith.constant dense<0.000000e+00> : vector<1xf32>
      %29 = vector.multi_reduction <add>, %28, %cst_40 [1, 2] : vector<1x2x128xf32> to vector<1xf32>
      %30 = vector.shape_cast %29 : vector<1xf32> to vector<1x1x1xf32>
      %c0_41 = arith.constant 0 : index
      %c0_42 = arith.constant 0 : index
      %c0_43 = arith.constant 0 : index
      %31 = vector.load %arg6[%c0_41, %c0_42, %c0_43] : memref<1x2x128xf32, #tpu.memory_space<vmem>>, vector<1x2x128xf32>
      %cst_44 = arith.constant dense<0.000000e+00> : vector<1xf32>
      %32 = vector.multi_reduction <add>, %31, %cst_44 [1, 2] : vector<1x2x128xf32> to vector<1xf32>
      %33 = vector.shape_cast %32 : vector<1xf32> to vector<1x1x1xf32>
      %c0_45 = arith.constant 0 : index
      %c0_46 = arith.constant 0 : index
      %c0_47 = arith.constant 0 : index
      %34 = vector.load %arg7[%c0_45, %c0_46, %c0_47] : memref<1x2x128xf32, #tpu.memory_space<vmem>>, vector<1x2x128xf32>
      %cst_48 = arith.constant dense<0.000000e+00> : vector<1xf32>
      %35 = vector.multi_reduction <add>, %34, %cst_48 [1, 2] : vector<1x2x128xf32> to vector<1xf32>
      %36 = vector.shape_cast %35 : vector<1xf32> to vector<1x1x1xf32>
      %c0_49 = arith.constant 0 : index
      %c0_50 = arith.constant 0 : index
      %c0_51 = arith.constant 0 : index
      %37 = vector.load %arg8[%c0_49, %c0_50, %c0_51] : memref<1x2x128xf32, #tpu.memory_space<vmem>>, vector<1x2x128xf32>
      %cst_52 = arith.constant dense<0.000000e+00> : vector<1xf32>
      %38 = vector.multi_reduction <add>, %37, %cst_52 [1, 2] : vector<1x2x128xf32> to vector<1xf32>
      %39 = vector.shape_cast %38 : vector<1xf32> to vector<1x1x1xf32>
      %40 = arith.mulf %30, %30 : vector<1x1x1xf32>
      %cst_53 = arith.constant 2.560000e+02 : f32
      %41 = vector.broadcast %cst_53 : f32 to vector<1x1x1xf32>
      %42 = arith.divf %40, %41 : vector<1x1x1xf32>
      %43 = arith.subf %33, %42 : vector<1x1x1xf32>
      %cst_54 = arith.constant 0.000000e+00 : f32
      %44 = vector.broadcast %cst_54 : f32 to vector<1x1x1xf32>
      %45 = arith.maximumf %43, %44 : vector<1x1x1xf32>
      %cst_55 = arith.constant 2.550000e+02 : f32
      %46 = vector.broadcast %cst_55 : f32 to vector<1x1x1xf32>
      %47 = arith.divf %45, %46 : vector<1x1x1xf32>
      %48 = arith.mulf %36, %36 : vector<1x1x1xf32>
      %cst_56 = arith.constant 2.560000e+02 : f32
      %49 = vector.broadcast %cst_56 : f32 to vector<1x1x1xf32>
      %50 = arith.divf %48, %49 : vector<1x1x1xf32>
      %51 = arith.subf %39, %50 : vector<1x1x1xf32>
      %cst_57 = arith.constant 0.000000e+00 : f32
      %52 = vector.broadcast %cst_57 : f32 to vector<1x1x1xf32>
      %53 = arith.maximumf %51, %52 : vector<1x1x1xf32>
      %cst_58 = arith.constant 2.550000e+02 : f32
      %54 = vector.broadcast %cst_58 : f32 to vector<1x1x1xf32>
      %55 = arith.divf %53, %54 : vector<1x1x1xf32>
      %56 = math.sqrt %47 : vector<1x1x1xf32>
      %57 = math.sqrt %55 : vector<1x1x1xf32>
      %cst_59 = arith.constant 5.000000e+00 : f32
      %58 = vector.broadcast %cst_59 : f32 to vector<1x1x1xf32>
      %59 = arith.divf %56, %58 : vector<1x1x1xf32>
      %cst_60 = arith.constant 5.000000e-03 : f32
      %60 = vector.broadcast %cst_60 : f32 to vector<1x1x1xf32>
      %61 = arith.maximumf %59, %60 : vector<1x1x1xf32>
      %62 = arith.subf %57, %61 : vector<1x1x1xf32>
      %63 = arith.mulf %62, %62 : vector<1x1x1xf32>
      %c0_61 = arith.constant 0 : index
      %c0_62 = arith.constant 0 : index
      %c0_63 = arith.constant 0 : index
      %64 = vector.load %arg4[%c0_61, %c0_62, %c0_63] : memref<1x1x1xf32, #tpu.memory_space<vmem>>, vector<1x1x1xf32>
      tpu.vector_store %arg4[%c0_61, %c0_62, %c0_63], %63 {strides = array<i32>} : memref<1x1x1xf32, #tpu.memory_space<vmem>>, vector<1x1x1xf32>,
    } else {
    }
    return
  }
  func.func @transform_0(%arg0: i32, %arg1: i32) -> (i32, i32, i32, i32) {
    %c0_i32 = arith.constant 0 : i32
    %c0_i32_0 = arith.constant 0 : i32
    %c0_i32_1 = arith.constant 0 : i32
    return %arg0, %c0_i32, %arg1, %c0_i32_0 : i32, i32, i32, i32
  }
  func.func @transform_1(%arg0: i32, %arg1: i32) -> (i32, i32, i32, i32) {
    %c0_i32 = arith.constant 0 : i32
    %c0_i32_0 = arith.constant 0 : i32
    %c0_i32_1 = arith.constant 0 : i32
    return %arg0, %c0_i32, %arg1, %c0_i32_0 : i32, i32, i32, i32
  }
  func.func @transform_2(%arg0: i32, %arg1: i32) -> (i32, i32, i32) {
    %c0_i32 = arith.constant 0 : i32
    %c0_i32_0 = arith.constant 0 : i32
    %c0_i32_1 = arith.constant 0 : i32
    return %arg0, %c0_i32, %c0_i32_0 : i32, i32, i32
  }
}

</mosaic_0001>

<bundles_post_ra>
// kernel: tpu_custom_call.1
= control target key start
LH: loop header
LB: loop body
LE: loop exit
PB: predicated region body
PF: predicated region fallthrough
CT: control target
= control target key end

     0   :  { %7 = vsyncpa [#allocation7], 0  ;;  %s834_s0 = inlined_call_operand.hbm [shape: f32[2,3,2,128], index: 0, kind: input, shape index: {}]   ;;  %s835_s1 = inlined_call_operand.hbm [shape: f32[2,3,2,128], index: 1, kind: input, shape index: {}]   ;;  %s836_s2 = inlined_call_operand.vmem [shape: f32[2,1,1], index: 2, kind: output, shape index: {}]  }
   0x1   :  { %9 = vsyncpa [#allocation7 + $0x1], 0 }
   0x2   :  { %10 = vsyncpa [#allocation9], 0 }
   0x3   :  { %12 = vsyncpa [#allocation9 + $0x1], 0  ;;  %s646_s9 = smov 0   ;;  %s648_s10 = smov 0  }
   0x4   :  { %s650_s11 = smov 0   ;;  %s652_s12 = smov 0  }
   0x5   :  { %s654_s13 = smov 0   ;;  %s656_s14 = smov 0  }
   0x6 LB: > { %s429_s15 = sadd.s32 4294967295, %s624_s14   ;;  %s30_s16 = sadd.s32 1, %s620_s13  ;;  %s624_s14 = sphi %s656_s14, %s18_s14   ;;  %s620_s13 = sphi %s654_s13, %s846_s13   ;;  %s616_s12 = sphi %s652_s12, %s845_s12   ;;  %s612_s11 = sphi %s650_s11, %s844_s11   ;;  %s608_s10 = sphi %s648_s10, %s843_s10   ;;  %s604_s9 = sphi %s646_s9, %s842_s9  }
   0x7   : > { %p32_p0 = scmp.ge.s32.totalorder %s30_s16, 2  ;;  %s39_s17 = sadd.s32 1, %s612_s11 }
   0x8   : > { %p46_p1 = scmp.ne.s32.totalorder %s612_s11, %s608_s10  ;;  %p47_p2 = scmp.eq.s32.totalorder %s624_s14, 0 }
   0x9   : > { %s848_s16 = smov (%p32_p0, %s30_s16), 0  ;;  %p52_p4 = scmp.ne.s32.totalorder %s608_s10, %s604_s9 }
   0xa   : > { %p48_p3 = por %p47_p2, %p46_p1  ;;  %s34_s18 = ssub.s32 %s620_s13, %s848_s16 }
   0xb   : > { %p53_p5 = scmp.eq.s32.totalorder %s429_s15, 0  ;;  %p37_p6 = scmp.eq.s32.totalorder %s34_s18, 0 }
   0xc   : > { %p454_p8 = scmp.lt.s32.totalorder %s624_s14, 2  ;;  %s694_s21 = sand.u32 1, %s612_s11  }
   0xd   : > { %p685_p7 = por %p53_p5, %p52_p4  ;;  %s439_s22 = smul.u32 96, %s620_s13 }
   0xe   : > { %s691_s20 = scalar_select %p37_p6, %s612_s11, %s39_s17  }
   0xf   : > { %s838_s19 = scalar_select %p685_p7, 1, 0 }
  0x10   : > { %s438_s23 = smul.u32 6, %s694_s21  ;;  %s703_s26 = scalar_lea.hbm %s834_s0, %s439_s22 }
  0x11   : > { %p705_p9 = pnand %p454_p8, %p48_p3  ;;  %s131_s30 = scalar_lea.sflag [#allocation7], %s694_s21 }
  0x12   : > { %s134_s28 = scalar_lea.vmem [#allocation6], %s438_s23  ;;  %s510_s3 = scalar_lea.hbm %s703_s26, 96 }
  0x13   : > { %s142_s29 = sshll.u32 %s134_s28, 4  ;;  %p511_p10 = scmp.ne.s32.totalorder %s703_s26, %s510_s3  ;;  %s711_s29 = int_to_ptr.vmem [resolvable:$true] %s142_s29 }
  0x14   : > { %p512_p11 = pneg %p705_p9  ;;  %s515_s6 = scalar_lea.hbm %s834_s0, 192 }
  0x15   : > { %p516_p0 = scmp.lt.u32.totalorder %s703_s26, %s834_s0  ;;  %p517_p1 = scmp.lt.u32.totalorder %s515_s6, %s510_s3 }
  0x16   : > { %p513_p12 = pnand %p512_p11, %p511_p10  ;;  %p519_p3 = scmp.lt.u32.totalorder %s510_s3, %s703_s26 }
  0x17   : > { %p518_p2 = por %p517_p1, %p516_p0 }
  0x18   : > { %p514_p13 = pneg %p513_p12 }
  0x19   : > { %p520_p4 = por %p519_p3, %p518_p2 }
  0x1b   : > { %p521_p5 = pnand %p520_p4, %p514_p13 }
  0x1d   : > { %524 = shalt.err (!%p521_p5)
}
  0x1e   : > { %s525_s9 = scalar_lea.vmem %s711_s29, 96  ;;  %s626_s15 = smov [#allocation6]  }
  0x1f   : > { %p526_p6 = scmp.ne.s32.totalorder %s711_s29, %s525_s9  ;;  %s530_s17 = sshll.u32 %s626_s15, 4  ;;  %s531_s17 = int_to_ptr.vmem [resolvable:$false] %s530_s17 }
  0x20   : > { %s532_s18 = scalar_lea.vmem %s531_s17, 192  ;;  %p533_p12 = scmp.lt.s32.totalorder %s711_s29, %s531_s17 }
  0x21   : > { %p528_p8 = pnand %p526_p6, %p512_p11  ;;  %p534_p0 = scmp.lt.s32.totalorder %s532_s18, %s525_s9 }
  0x23   : > { %p529_p10 = pneg %p528_p8  ;;  %p535_p1 = por %p534_p0, %p533_p12 }
  0x25   : > { %p536_p2 = pnand %p535_p1, %p529_p10 }
  0x27   : > { %539 = shalt.err (!%p536_p2)
}
  0x28   : > { %s627_s24 = smov 32   ;;  %s628_s25 = smov 2  }
  0x29   : > { %450 = dma.hbm_to_vmem [thread:$0]  (!%p705_p9), %s703_s26, 96, %s711_s29, %s131_s30, %s627_s24, %s627_s24, %s628_s25  }
  0x2a   : > { %p435_p13 = scmp.ge.s32.totalorder %s624_s14, 1  ;;  %p172_p3 = scmp.lt.s32.totalorder %s624_s14, 3 }
  0x2b   : > { %s755_s5 = scalar_lea.hbm %s835_s1, %s439_s22  ;;  %s156_s6 = scalar_lea.vmem [#allocation8], %s438_s23 }
  0x2c   : > { %p746_p4 = pnand %p435_p13, %p172_p3  ;;  %s164_s7 = sshll.u32 %s156_s6, 4  ;;  %s759_s7 = int_to_ptr.vmem [resolvable:$true] %s164_s7 }
  0x2d   : > { %s153_s26 = scalar_lea.sflag [#allocation9], %s694_s21  ;;  %s540_s29 = scalar_lea.hbm %s755_s5, 96 }
  0x2e   : > { %p541_p5 = scmp.ne.s32.totalorder %s755_s5, %s540_s29  ;;  %s545_s22 = scalar_lea.hbm %s835_s1, 192 }
  0x2f   : > { %p546_p10 = scmp.lt.u32.totalorder %s755_s5, %s835_s1  ;;  %p547_p12 = scmp.lt.u32.totalorder %s545_s22, %s540_s29 }
  0x30   : > { %p543_p6 = pnand %p541_p5, %p512_p11  ;;  %p549_p1 = scmp.lt.u32.totalorder %s540_s29, %s755_s5 }
  0x31   : > { %p548_p0 = por %p547_p12, %p546_p10 }
  0x32   : > { %p544_p8 = pneg %p543_p6 }
  0x33   : > { %p550_p2 = por %p549_p1, %p548_p0 }
  0x35   : > { %p551_p13 = pnand %p550_p2, %p544_p8 }
  0x37   : > { %554 = shalt.err (!%p551_p13)
}
  0x38   : > { %s555_s23 = scalar_lea.vmem %s759_s7, 96  ;;  %s629_s17 = smov [#allocation8]  }
  0x39   : > { %p556_p3 = scmp.ne.s32.totalorder %s759_s7, %s555_s23  ;;  %s560_s18 = sshll.u32 %s629_s17, 4  ;;  %s561_s18 = int_to_ptr.vmem [resolvable:$false] %s560_s18 }
  0x3a   : > { %s562_s3 = scalar_lea.vmem %s561_s18, 192  ;;  %p563_p7 = scmp.lt.s32.totalorder %s759_s7, %s561_s18 }
  0x3b   : > { %p558_p5 = pnand %p556_p3, %p512_p11  ;;  %p564_p10 = scmp.lt.s32.totalorder %s562_s3, %s555_s23 }
  0x3d   : > { %p559_p6 = pneg %p558_p5  ;;  %p565_p12 = por %p564_p10, %p563_p7 }
  0x3f   : > { %p566_p0 = pnand %p565_p12, %p559_p6 }
  0x41   : > { %569 = shalt.err (!%p566_p0)
}
  0x42   : > { %453 = dma.hbm_to_vmem [thread:$0]  (!%p705_p9), %s755_s5, 96, %s759_s7, %s153_s26, %s627_s24, %s627_s24, %s628_s25  }
  0x43   : > { %176 = sbr.rel (%p746_p4) target bundleno = 288 (0x120), region = 28  ;;  %s178_s4 = sand.u32 (!%p746_p4), 1, %s608_s10  }
  0x44   : > { %s442_s6 = smul.u32 (!%p746_p4), 6, %s178_s4  ;;  %s179_s29 = scalar_lea.sflag (!%p746_p4), [#allocation7], %s178_s4 }
  0x45   : > { %p841_p7 = scmp.ne.s32.totalorder (!%p746_p4), %s838_s19, 0 }
  0x46   : > { %s182_s30 = scalar_lea.vmem (!%p746_p4), [#allocation6], %s442_s6 }
  0x4a   : > { %595 = dma.done.wait (%p841_p7), %s179_s29, 96  }
  0x4b   : > { %597 = vsyncadd (%p841_p7), %s179_s29, 4294967200  ;;  %s188_s27 = scalar_lea.sflag [#allocation9], %s178_s4  ;;  %s191_s21 = scalar_lea.vmem [#allocation8], %s442_s6 }
  0x4c   : > { %599 = dma.done.wait (%p841_p7), %s188_s27, 96  }
  0x4d   : > { %601 = vsyncadd (%p841_p7), %s188_s27, 4294967200  ;;  %v630_v0 = vmov 0.0   ;;  %vm229_vm0 = vcmask 1041408   ;;  %v236_v1 = vld [vmem:[%s191_s21] sm:$0x3]  ;;  %p215_p9 = scmp.lt.s32.totalorder %s616_s12, 1 }
  0x4e   : > { %224 = vst [vmem:[#allocation4] sm:$0x3] %v630_v0  ;;  %222 = vst [vmem:[#allocation2] sm:$0x3] %v630_v0  ;;  %v237_v2 = vld [vmem:[%s191_s21 + $0x2] sm:$0x3] }
  0x4f   : > { %223 = vst [vmem:[#allocation3] sm:$0x3] %v630_v0  ;;  %225 = vst [vmem:[#allocation5] sm:$0x3] %v630_v0  ;;  %v238_v3 = vld [vmem:[%s191_s21 + $0x4] sm:$0x3] }
  0x50   : > { %v239_v4 = vsel %vm229_vm0, %v236_v1, 0.0  ;;  %v240_v5 = vsel %vm229_vm0, %v237_v2, 0.0  ;;  %v242_v6 = vsel %vm229_vm0, %v238_v3, 0.0  ;;  %v226_v8 = vld [vmem:[%s182_s30] sm:$0x3]  ;;  %s850_s12 = smov (!%p215_p9, %s616_s12), 1 }
  0x51   : > { %v241_v7 = vadd.f32 %v240_v5, %v239_v4  ;;  %v227_v9 = vld [vmem:[%s182_s30 + $0x2] sm:$0x3]  ;;  %v228_v10 = vld [vmem:[%s182_s30 + $0x4] sm:$0x3]  ;;  %v230_v11 = vsel %vm229_vm0, %v226_v8, 0.0  ;;  %s217_s25 = scalar_lea.vmem %s836_s2, %s850_s12  ;;  %vm333_vm5 = vcmask 0  }
  0x52   : > { %v231_v12 = vsel %vm229_vm0, %v227_v9, 0.0  ;;  %v233_v13 = vsel %vm229_vm0, %v228_v10, 0.0 }
  0x53   : > { %v243_v14 = vadd.f32 %v242_v6, %v241_v7  ;;  %v232_v15 = vadd.f32 %v231_v12, %v230_v11 }
  0x55   : > { %v252_v16 = vld [vmem:[#allocation4] sm:$0x3]  ;;  %v244_v17 = vmul.f32 0.33333334, %v243_v14  ;;  %v234_v18 = vadd.f32 %v233_v13, %v232_v15  ;;  %v245_v19 = vld [vmem:[#allocation2] sm:$0x3] }
  0x56   : > { %v255_v20 = vld [vmem:[#allocation5] sm:$0x3]  ;;  %v248_v24 = vld [vmem:[#allocation3] sm:$0x3] }
  0x57   : > { %v253_v21 = vadd.f32 %v252_v16, %v244_v17  ;;  %v235_v22 = vmul.f32 0.33333334, %v234_v18  ;;  %v256_v23 = vmul.f32 %v244_v17, %v244_v17 }
  0x59   : > { %254 = vst [vmem:[#allocation4] sm:$0x3] %v253_v21  ;;  %v246_v25 = vadd.f32 %v245_v19, %v235_v22  ;;  %v257_v26 = vadd.f32 %v256_v23, %v255_v20  ;;  %v249_v27 = vmul.f32 %v235_v22, %v235_v22 }
  0x5b   : > { %247 = vst [vmem:[#allocation2] sm:$0x3] %v246_v25  ;;  %258 = vst [vmem:[#allocation5] sm:$0x3] %v257_v26  ;;  %v250_v28 = vadd.f32 %v249_v27, %v248_v24 }
  0x5d   : > { %251 = vst [vmem:[#allocation3] sm:$0x3] %v250_v28 }
  0x60   : > { %v282_v29 = vld [vmem:[#allocation4] sm:$0x3] }
  0x61   : > { %v283_v30 = vsel %vm229_vm0, %v282_v29, 0.0 }
  0x62   : > { %284 = vadd.xlane.f32.xlu1 %v283_v30  ;;  %v262_v31 = vld [vmem:[#allocation2] sm:$0x3]  ;;  %v292_v32 = vld [vmem:[#allocation5] sm:$0x3] }
  0x63   : > { %v263_v33 = vsel %vm229_vm0, %v262_v31, 0.0  ;;  %v293_v34 = vsel %vm229_vm0, %v292_v32, 0.0 }
  0x64   : > { %264 = vadd.xlane.f32.xlu0 %v263_v33  ;;  %v272_v35 = vld [vmem:[#allocation3] sm:$0x3] }
  0x65   : > { %v273_v36 = vsel %vm229_vm0, %v272_v35, 0.0 }
  0x66   : > { %294 = vadd.xlane.f32.xlu1 %v293_v34 }
  0x68   : > { %274 = vadd.xlane.f32.xlu0 %v273_v36 }
  0xef   : > { %v285_v37 = vpop.xlane.xlu1 %284 }
  0xf0   : > { %v286_v38 = vrot.slane %v285_v37, 4 }
  0xf1   : > { %v265_v39 = vpop.xlane.xlu0 %264 }
  0xf2   : > { %v287_v40 = vadd.f32 %v286_v38, %v285_v37  ;;  %v266_v41 = vrot.slane %v265_v39, 4 }
  0xf3   : > { %v295_v42 = vpop.xlane.xlu1 %294 }
  0xf4   : > { %v288_v43 = vrot.slane %v287_v40, 2  ;;  %v267_v44 = vadd.f32 %v266_v41, %v265_v39  ;;  %v296_v45 = vrot.slane %v295_v42, 4 }
  0xf5   : > { %v275_v46 = vpop.xlane.xlu0 %274 }
  0xf6   : > { %v289_v47 = vadd.f32 %v288_v43, %v287_v40  ;;  %v268_v48 = vrot.slane %v267_v44, 2  ;;  %v297_v49 = vadd.f32 %v296_v45, %v295_v42  ;;  %v276_v50 = vrot.slane %v275_v46, 4 }
  0xf8   : > { %v290_v51 = vrot.slane %v289_v47, 1  ;;  %v269_v52 = vadd.f32 %v268_v48, %v267_v44  ;;  %v298_v53 = vrot.slane %v297_v49, 2  ;;  %v277_v54 = vadd.f32 %v276_v50, %v275_v46 }
  0xfa   : > { %v291_v55 = vadd.f32 %v290_v51, %v289_v47  ;;  %v270_v56 = vrot.slane %v269_v52, 1  ;;  %v299_v57 = vadd.f32 %v298_v53, %v297_v49  ;;  %v278_v58 = vrot.slane %v277_v54, 2 }
  0xfc   : > { %v309_v59 = vmul.f32 %v291_v55, %v291_v55  ;;  %v271_v60 = vadd.f32 %v270_v56, %v269_v52  ;;  %v300_v61 = vrot.slane %v299_v57, 1  ;;  %v279_v62 = vadd.f32 %v278_v58, %v277_v54 }
  0xfe   : > { %v310_v63 = vmul.f32 0.00390625, %v309_v59  ;;  %v302_v0 = vmul.f32 %v271_v60, %v271_v60  ;;  %v301_v1 = vadd.f32 %v300_v61, %v299_v57  ;;  %v280_v2 = vrot.slane %v279_v62, 1 }
 0x100   : > { %v304_v3 = vmul.f32 0.00390625, %v302_v0  ;;  %v311_v4 = vsub.f32 %v301_v1, %v310_v63  ;;  %v281_v5 = vadd.f32 %v280_v2, %v279_v62 }
 0x102   : > { %v312_v6 = vmax.f32 %v311_v4, 0.0  ;;  %v305_v7 = vsub.f32 %v281_v5, %v304_v3 }
 0x104   : > { %v313_v8 = vmul.f32 0.003921569, %v312_v6  ;;  %v306_v9 = vmax.f32 %v305_v7, 0.0 }
 0x106   : > { %506 = vrsqrt.f32 %v313_v8  ;;  %v308_v10 = vmul.f32 0.003921569, %v306_v9  ;;  %vm323_vm3 = vcmp.eq.f32.partialorder %v313_v8, inf  ;;  %v326_v20 = vand.u32 2147483648, %v313_v8 }
 0x107   : > { %vm325_vm4 = vcmp.eq.f32.partialorder %v313_v8, 0.0 }
 0x108   : > { %508 = vrsqrt.f32 %v308_v10  ;;  %vm316_vm1 = vcmp.eq.f32.partialorder %v308_v10, inf  ;;  %v319_v15 = vand.u32 2147483648, %v308_v10  ;;  %vm318_vm2 = vcmp.eq.f32.partialorder %v308_v10, 0.0 }
 0x110   : > { %v507_v11 = vpop.eup %506 }
 0x111   : > { %v322_v13 = vmul.f32 %v507_v11, %v313_v8 }
 0x112   : > { %v509_v12 = vpop.eup %508 }
 0x113   : > { %v315_v14 = vmul.f32 %v509_v12, %v308_v10  ;;  %v324_v18 = vsel %vm323_vm3, %v313_v8, %v322_v13 }
 0x114   : > { %v327_v22 = vsel %vm325_vm4, %v326_v20, %v324_v18 }
 0x115   : > { %v317_v16 = vsel %vm316_vm1, %v308_v10, %v315_v14 }
 0x116   : > { %v320_v17 = vsel %vm318_vm2, %v319_v15, %v317_v16 }
 0x117   : > { %v329_v19 = vmul.f32 0.2, %v320_v17 }
 0x119   : > { %v330_v21 = vmax.f32 %v329_v19, 0.005 }
 0x11b   : > { %v331_v23 = vsub.f32 %v327_v22, %v330_v21 }
 0x11d   : > { %v332_v24 = vmul.f32 %v331_v23, %v331_v23 }
 0x11f   : > { %334 = vst.msk [vmem:[%s217_s25] sm:$0x1] %vm333_vm5, %v332_v24 }
 0x120 PF: > { %s18_s14 = sadd.s32 1, %s624_s14   ;;  %s842_s9 = smov %s608_s10 }
 0x121   : > { %p15_p11 = scmp.ge.s32.totalorder %s18_s14, 4   ;;  %s843_s10 = smov %s612_s11 }
 0x122   : > { %s844_s11 = smov %s691_s20  ;;  %s845_s12 = smov %s620_s13 }
 0x123   : > { %s846_s13 = smov %s848_s16  ;;  %17 = sbr.rel (!%p15_p11) target bundleno = 6 (0x6), region = 89 }
 0x12a   :  { %352 = vsyncpa [#allocation7], 1 }
 0x12b   :  { %354 = vsyncpa [#allocation7 + $0x1], 1 }
 0x12c   :  { %355 = vsyncpa [#allocation9], 1 }
 0x12d   :  { %357 = vsyncpa [#allocation9 + $0x1], 1 }

</bundles_post_ra>
